<compile_context>
chip_gen: v5e
topology: v5e:2x2
jax: 0.10.0
libtpu: 0.0.40
codegen_flags: <defaults>
</compile_context>

<pallas_src>
import functools
import math

import jax
import jax.numpy as jnp
from jax.experimental import pallas as pl
from jax.experimental.pallas import tpu as pltpu


# -----------------------------------------------------------------------------
# Fused kernel: full Lloyd loop + final distances + is_centroid in one launch.
#   in : x_aug (N, D+1) f32  (last column == 1), init_centers (K, D) f32
#   out: centers (K, D) f32, assign (N, 1) i32, dist (N, K_pad) f32,
#        is_centroid (N, 1) i32
# -----------------------------------------------------------------------------
def _kmeans_fused_kernel(xa_ref, c0_ref, centers_ref, assign_ref, dist_ref,
                         cent_ref, *, tol, max_iters, use_bf16):
    xa = xa_ref[...].astype(jnp.float32)                    # (N, D+1), last col == 1
    N = xa.shape[0]
    K, D = c0_ref.shape
    Kp = dist_ref.shape[1]

    x = xa[:, :D]                                           # (N, D)
    mm_dtype = jnp.bfloat16 if use_bf16 else jnp.float32
    x_mm = x.astype(mm_dtype)                               # hoisted out of the loop
    xa_mm = xa.astype(mm_dtype)

    col = jax.lax.broadcasted_iota(jnp.int32, (N, K), 1)    # (N, K), hoisted
    ones_row = jnp.ones((1, D), jnp.float32)                # hoisted

    def c2_row(centers):
        # ||c||^2 as a (1, K) row via a tiny MXU matmul (stays lane-aligned,
        # avoids a (K,1)->(1,K) relayout).
        return jax.lax.dot_general(ones_row, centers * centers,
                                   (((1,), (1,)), ((), ())),
                                   preferred_element_type=jnp.float32)

    def assign_from(centers):
        # argmin_k ||x - c_k||^2 == argmin_k (||c_k||^2 - 2 x.c_k)
        # (the ||x||^2 term is constant per row -> dropped in the hot loop)
        xc = jax.lax.dot_general(x_mm, centers.astype(mm_dtype),
                                 (((1,), (1,)), ((), ())),
                                 preferred_element_type=jnp.float32)      # (N, K)
        score = c2_row(centers) - 2.0 * xc
        min_s = jnp.min(score, axis=1, keepdims=True)
        # first index on ties (matches torch.argmin)
        return jnp.min(jnp.where(score == min_s, col, K), axis=1, keepdims=True)

    def body(carry):
        centers, _, _, it = carry
        assign = assign_from(centers)                                     # (N, 1)
        onehot = (col == assign).astype(mm_dtype)                         # (N, K)
        # ONE MXU matmul yields per-cluster feature sums AND member counts
        # (last augmented column of x_aug is all ones).
        sums_aug = jax.lax.dot_general(onehot, xa_mm,
                                       (((0,), (0,)), ((), ())),
                                       preferred_element_type=jnp.float32)  # (K, D+1)
        sums = sums_aug[:, :D]                                            # (K, D)
        counts = sums_aug[:, D:D + 1]                                     # (K, 1)
        # TODO(synk): reference re-samples a *random* data point for an empty
        # cluster; here we deterministically keep the previous center instead.
        new_c = jnp.where(counts > 0.0, sums / jnp.maximum(counts, 1.0), centers)
        d = new_c - centers
        shift = jnp.sum(jnp.sqrt(jnp.sum(d * d, axis=1, keepdims=True)))
        return new_c, assign, shift * shift, it + 1

    def cond(carry):
        _, _, shift_sq, it = carry
        # TODO(synk): reference loops until convergence with no iteration cap;
        # we cap at max_iters for safety.
        return jnp.logical_and(shift_sq >= tol, it < max_iters)

    init = (c0_ref[...].astype(jnp.float32),
            jnp.zeros((N, 1), jnp.int32),
            jnp.array(jnp.inf, jnp.float32),
            jnp.array(0, jnp.int32))
    centers, assign, _, _ = jax.lax.while_loop(cond, body, init)

    centers_ref[...] = centers
    assign_ref[...] = assign

    # ---- final true distances + is_centroid ('train' mode), computed once ----
    x2 = jnp.sum(x * x, axis=1, keepdims=True)                            # (N, 1)
    xc = jax.lax.dot_general(x_mm, centers.astype(mm_dtype),
                             (((1,), (1,)), ((), ())),
                             preferred_element_type=jnp.float32)          # (N, K)
    dist = jnp.maximum(x2 + c2_row(centers) - 2.0 * xc, 0.0)              # (N, K)

    member = (assign == col)                                              # (N, K)
    masked = jnp.where(member, dist, jnp.float32(jnp.inf))
    min_per_cluster = jnp.min(masked, axis=0, keepdims=True)              # (1, K)
    nonempty = jnp.max(jnp.where(member, 1, 0), axis=0, keepdims=True) > 0
    # Matches the reference ('train' mode): the flag is NOT restricted to the
    # cluster's own members -- any node whose distance to a non-empty cluster
    # equals that cluster's member-minimum is flagged.
    # TODO(synk): mode='test' picks one random index among the ties.
    hit = jnp.where((dist == min_per_cluster) & nonempty, 1, 0)           # (N, K)
    cent_ref[...] = jnp.max(hit, axis=1, keepdims=True).astype(jnp.int32)

    # Lane-dense (N, Kp) distance output: place the K real columns into the
    # first K lanes with a 0/1 selection matmul (avoids unaligned lane
    # concat / partial-width stores; values are copied exactly).
    sel = (jax.lax.broadcasted_iota(jnp.int32, (K, Kp), 0)
           == jax.lax.broadcasted_iota(jnp.int32, (K, Kp), 1)).astype(jnp.float32)
    dist_ref[...] = jax.lax.dot_general(dist, sel, (((1,), (0,)), ((), ())),
                                        preferred_element_type=jnp.float32)


def _kmeans_cluster_call(x, init_centers, *, tol, max_iters, use_bf16=False):
    N, D = x.shape
    K = init_centers.shape[0]
    Kp = ((K + 127) // 128) * 128          # lane-dense dist output (K=3 -> 128)

    # Augmented features [x | 1] so one matmul yields sums and counts.
    x_aug = jnp.concatenate([x, jnp.ones((N, 1), jnp.float32)], axis=1)   # (N, D+1)

    kernel = functools.partial(_kmeans_fused_kernel, tol=float(tol),
                               max_iters=int(max_iters), use_bf16=bool(use_bf16))

    cost = pl.CostEstimate(
        flops=int(4 * N * K * D * max_iters + 2 * N * K * Kp),
        transcendentals=int(K * max_iters),
        bytes_accessed=int(4 * (N * (D + 1) + 2 * K * D + N * Kp + 2 * N)),
    )

    # TODO(synk): for large N*D, tile the N axis (grid=(cdiv(N,TN),)) with
    # accumulator scratch; not needed at these tree-node sizes.
    return pl.pallas_call(
        kernel,
        grid=(1,),
        in_specs=[
            pl.BlockSpec((N, D + 1), lambda i: (0, 0)),
            pl.BlockSpec((K, D), lambda i: (0, 0)),
        ],
        out_specs=(
            pl.BlockSpec((K, D), lambda i: (0, 0)),
            pl.BlockSpec((N, 1), lambda i: (0, 0)),
            pl.BlockSpec((N, Kp), lambda i: (0, 0)),
            pl.BlockSpec((N, 1), lambda i: (0, 0)),
        ),
        out_shape=(
            jax.ShapeDtypeStruct((K, D), jnp.float32),
            jax.ShapeDtypeStruct((N, 1), jnp.int32),
            jax.ShapeDtypeStruct((N, Kp), jnp.float32),
            jax.ShapeDtypeStruct((N, 1), jnp.int32),
        ),
        compiler_params=pltpu.CompilerParams(
            dimension_semantics=("arbitrary",),
            vmem_limit_bytes=32 * 1024 * 1024,
        ),
        cost_estimate=cost,
    )(x_aug, init_centers)


# -----------------------------------------------------------------------------
# ClusterModel.forward (cluster_type='kmeans', mode='train')
# -----------------------------------------------------------------------------
def cluster_model_forward(node_feat, num_clusters=3, extract_ratio=None,
                          tol=1e-6, max_iters=100, seed=0, use_bf16=False):
    N, D = node_feat.shape

    # replicate the num_clusters selection logic of cluster_by_kmeans (static)
    if extract_ratio is None:
        k = num_clusters
        while k >= N and k != 1:
            k = math.ceil(k / 2)
    else:
        k = int(math.floor(N * extract_ratio))
        k = k + 1 if k == 0 else k

    x = node_feat.astype(jnp.float32)

    if N > 1:
        # kmeans_pytorch `initialize`: k distinct random rows as initial centers
        # TODO(synk): uses jax.random instead of the reference's numpy RNG.
        key = jax.random.PRNGKey(seed)
        idx = jax.random.choice(key, N, shape=(k,), replace=False)
        init_centers = x[idx]

        centers, assign, dist_p, cent = _kmeans_cluster_call(
            x, init_centers, tol=tol, max_iters=max_iters, use_bf16=use_bf16)
        cluster_ids = assign[:, 0]
        dist = dist_p[:, :k]
        is_centroid = cent[:, 0]
    else:
        # degenerate single-node tree: mirrors the reference's shortcut branch
        cluster_ids = jnp.zeros((1,), jnp.int32)
        centers = x
        dist = jnp.sum((x - centers) ** 2, axis=1, keepdims=True)
        is_centroid = jnp.ones((1,), jnp.int32)

    return cluster_ids, centers, dist, is_centroid


if __name__ == "__main__":
    key = jax.random.PRNGKey(0)
    N, D = 8, 32                      # small node_feat: 8 tree nodes, 32-dim features
    node_feat = jax.random.normal(key, (N, D), dtype=jnp.float32)

    cluster_ids, cluster_centers, dist, is_centroid = cluster_model_forward(
        node_feat, num_clusters=3)
    jax.block_until_ready((cluster_ids, cluster_centers, dist, is_centroid))

    K = cluster_centers.shape[0]
    assert cluster_ids.shape == (N,)
    assert cluster_centers.shape == (K, D)
    assert dist.shape == (N, K)
    assert is_centroid.shape == (N,)
    assert bool(jnp.all((cluster_ids >= 0) & (cluster_ids < K)))
    assert bool(jnp.all(dist >= 0.0))
    print("KERNEL_OK")
</pallas_src>

<mosaic_0001>
module attributes {stable_mosaic.version = 11 : i64} {
  func.func @_kmeans_fused_kernel(%arg0: i32, %arg1: memref<8x33xf32, #tpu.memory_space<vmem>>, %arg2: memref<3x32xf32, #tpu.memory_space<vmem>>, %arg3: memref<3x32xf32, #tpu.memory_space<vmem>>, %arg4: memref<8x1xi32, #tpu.memory_space<vmem>>, %arg5: memref<8x128xf32, #tpu.memory_space<vmem>>, %arg6: memref<8x1xi32, #tpu.memory_space<vmem>>) attributes {dimension_semantics = [#tpu.dimension_semantics<arbitrary>], iteration_bounds = array<i64: 1>, scalar_prefetch = 0 : i64, scratch_operands = 0 : i64, tpu.core_type = #tpu.core_type<tc>, window_params = [{pipeline_mode = #tpu.pipeline_mode<synchronous>, transform_indices = @transform_0, window_bounds = array<i64: 8, 33>}, {pipeline_mode = #tpu.pipeline_mode<synchronous>, transform_indices = @transform_1, window_bounds = array<i64: 3, 32>}, {pipeline_mode = #tpu.pipeline_mode<synchronous>, transform_indices = @transform_2, window_bounds = array<i64: 3, 32>}, {pipeline_mode = #tpu.pipeline_mode<synchronous>, transform_indices = @transform_3, window_bounds = array<i64: 8, 1>}, {pipeline_mode = #tpu.pipeline_mode<synchronous>, transform_indices = @transform_4, window_bounds = array<i64: 8, 128>}, {pipeline_mode = #tpu.pipeline_mode<synchronous>, transform_indices = @transform_5, window_bounds = array<i64: 8, 1>}]} {
    %c0 = arith.constant 0 : index
    %c0_0 = arith.constant 0 : index
    %0 = vector.load %arg1[%c0, %c0_0] : memref<8x33xf32, #tpu.memory_space<vmem>>, vector<8x33xf32>
    %1 = vector.extract_strided_slice %0 {offsets = [0, 0], sizes = [8, 32], strides = [1, 1]} : vector<8x33xf32> to vector<8x32xf32>
    %2 = tpu.iota {dimensions = array<i32: 1>} : vector<8x3xi32>
    %cst = arith.constant 1.000000e+00 : f32
    %3 = vector.broadcast %cst : f32 to vector<1x32xf32>
    %c0_1 = arith.constant 0 : index
    %c0_2 = arith.constant 0 : index
    %4 = vector.load %arg2[%c0_1, %c0_2] : memref<3x32xf32, #tpu.memory_space<vmem>>, vector<3x32xf32>
    %c0_i32 = arith.constant 0 : i32
    %5 = vector.broadcast %c0_i32 : i32 to vector<8x1xi32>
    %cst_3 = arith.constant 0x7F800000 : f32
    %c0_i32_4 = arith.constant 0 : i32
    %6:4 = scf.while (%arg7 = %4, %arg8 = %5, %arg9 = %cst_3, %arg10 = %c0_i32_4) : (vector<3x32xf32>, vector<8x1xi32>, f32, i32) -> (vector<3x32xf32>, vector<8x1xi32>, f32, i32) {
      %cst_27 = arith.constant 9.99999997E-7 : f32
      %53 = arith.cmpf oge, %arg9, %cst_27 : f32
      %c100_i32 = arith.constant 100 : i32
      %54 = arith.cmpi slt, %arg10, %c100_i32 : i32
      %55 = arith.andi %53, %54 : i1
      scf.condition(%55) %arg7, %arg8, %arg9, %arg10 : vector<3x32xf32>, vector<8x1xi32>, f32, i32
    } do {
    ^bb0(%arg7: vector<3x32xf32>, %arg8: vector<8x1xi32>, %arg9: f32, %arg10: i32):
      %cst_27 = arith.constant dense<0.000000e+00> : vector<8x3xf32>
      %53 = tpu.matmul %1, %arg7, %cst_27 {dimension_numbers = #tpu.dot_dimension_numbers<[1], [1], [0], [0], [0, 0, 1, 0], [], []>} : vector<8x32xf32>, vector<3x32xf32>, vector<8x3xf32> -> vector<8x3xf32>
      %54 = arith.mulf %arg7, %arg7 : vector<3x32xf32>
      %cst_28 = arith.constant dense<0.000000e+00> : vector<1x3xf32>
      %55 = tpu.matmul %3, %54, %cst_28 {dimension_numbers = #tpu.dot_dimension_numbers<[1], [1], [0], [0], [0, 0, 1, 0], [], []>} : vector<1x32xf32>, vector<3x32xf32>, vector<1x3xf32> -> vector<1x3xf32>
      %cst_29 = arith.constant 2.000000e+00 : f32
      %56 = vector.broadcast %cst_29 : f32 to vector<8x3xf32>
      %57 = arith.mulf %56, %53 : vector<8x3xf32>
      %58 = vector.broadcast %55 : vector<1x3xf32> to vector<8x3xf32>
      %59 = arith.subf %58, %57 : vector<8x3xf32>
      %cst_30 = arith.constant dense<0x7F800000> : vector<8xf32>
      %60 = vector.multi_reduction <minimumf>, %59, %cst_30 [1] : vector<8x3xf32> to vector<8xf32>
      %61 = vector.shape_cast %60 : vector<8xf32> to vector<8x1xf32>
      %62 = vector.broadcast %61 : vector<8x1xf32> to vector<8x3xf32>
      %63 = arith.cmpf oeq, %59, %62 : vector<8x3xf32>
      %c3_i32 = arith.constant 3 : i32
      %64 = vector.broadcast %c3_i32 : i32 to vector<8x3xi32>
      %65 = arith.select %63, %2, %64 : vector<8x3xi1>, vector<8x3xi32>
      %cst_31 = arith.constant dense<2147483647> : vector<8xi32>
      %66 = vector.multi_reduction <minsi>, %65, %cst_31 [1] : vector<8x3xi32> to vector<8xi32>
      %67 = vector.shape_cast %66 : vector<8xi32> to vector<8x1xi32>
      %68 = vector.broadcast %67 : vector<8x1xi32> to vector<8x3xi32>
      %69 = arith.cmpi eq, %2, %68 : vector<8x3xi32>
      %70 = arith.extui %69 : vector<8x3xi1> to vector<8x3xi32>
      %71 = arith.sitofp %70 : vector<8x3xi32> to vector<8x3xf32>
      %cst_32 = arith.constant dense<0.000000e+00> : vector<3x33xf32>
      %72 = tpu.matmul %71, %0, %cst_32 {dimension_numbers = #tpu.dot_dimension_numbers<[0], [0], [1], [1], [0, 1, 1, 1], [], []>} : vector<8x3xf32>, vector<8x33xf32>, vector<3x33xf32> -> vector<3x33xf32>
      %73 = vector.extract_strided_slice %72 {offsets = [0, 0], sizes = [3, 32], strides = [1, 1]} : vector<3x33xf32> to vector<3x32xf32>
      %74 = vector.extract_strided_slice %72 {offsets = [0, 32], sizes = [3, 1], strides = [1, 1]} : vector<3x33xf32> to vector<3x1xf32>
      %cst_33 = arith.constant 0.000000e+00 : f32
      %75 = vector.broadcast %cst_33 : f32 to vector<3x1xf32>
      %76 = arith.cmpf ogt, %74, %75 : vector<3x1xf32>
      %cst_34 = arith.constant 1.000000e+00 : f32
      %77 = vector.broadcast %cst_34 : f32 to vector<3x1xf32>
      %78 = arith.maximumf %74, %77 : vector<3x1xf32>
      %79 = vector.broadcast %78 : vector<3x1xf32> to vector<3x32xf32>
      %80 = arith.divf %73, %79 : vector<3x32xf32>
      %81 = vector.shape_cast %76 : vector<3x1xi1> to vector<3x1xi1>
      %82 = vector.broadcast %81 : vector<3x1xi1> to vector<3x32xi1>
      %83 = arith.select %82, %80, %arg7 : vector<3x32xi1>, vector<3x32xf32>
      %84 = arith.subf %83, %arg7 : vector<3x32xf32>
      %85 = arith.mulf %84, %84 : vector<3x32xf32>
      %cst_35 = arith.constant dense<0.000000e+00> : vector<3xf32>
      %86 = vector.multi_reduction <add>, %85, %cst_35 [1] : vector<3x32xf32> to vector<3xf32>
      %87 = vector.shape_cast %86 : vector<3xf32> to vector<3x1xf32>
      %88 = math.sqrt %87 : vector<3x1xf32>
      %89 = vector.shape_cast %88 : vector<3x1xf32> to vector<1x3x1xf32>
      %cst_36 = arith.constant dense<0.000000e+00> : vector<1xf32>
      %90 = vector.multi_reduction <add>, %89, %cst_36 [1, 2] : vector<1x3x1xf32> to vector<1xf32>
      %91 = vector.shape_cast %90 : vector<1xf32> to vector<1x1x1xf32>
      %92 = vector.extract %91[0, 0, 0] : f32 from vector<1x1x1xf32>
      %93 = arith.mulf %92, %92 : f32
      %c1_i32_37 = arith.constant 1 : i32
      %94 = arith.addi %arg10, %c1_i32_37 : i32
      scf.yield %83, %67, %93, %94 : vector<3x32xf32>, vector<8x1xi32>, f32, i32
    }
    %c0_5 = arith.constant 0 : index
    %c0_6 = arith.constant 0 : index
    %7 = vector.load %arg3[%c0_5, %c0_6] : memref<3x32xf32, #tpu.memory_space<vmem>>, vector<3x32xf32>
    tpu.vector_store %arg3[%c0_5, %c0_6], %6#0 {strides = array<i32>} : memref<3x32xf32, #tpu.memory_space<vmem>>, vector<3x32xf32>,
    %c0_7 = arith.constant 0 : index
    %c0_8 = arith.constant 0 : index
    %8 = vector.load %arg4[%c0_7, %c0_8] : memref<8x1xi32, #tpu.memory_space<vmem>>, vector<8x1xi32>
    tpu.vector_store %arg4[%c0_7, %c0_8], %6#1 {strides = array<i32>} : memref<8x1xi32, #tpu.memory_space<vmem>>, vector<8x1xi32>,
    %9 = arith.mulf %1, %1 : vector<8x32xf32>
    %cst_9 = arith.constant dense<0.000000e+00> : vector<8xf32>
    %10 = vector.multi_reduction <add>, %9, %cst_9 [1] : vector<8x32xf32> to vector<8xf32>
    %11 = vector.shape_cast %10 : vector<8xf32> to vector<8x1xf32>
    %cst_10 = arith.constant dense<0.000000e+00> : vector<8x3xf32>
    %12 = tpu.matmul %1, %6#0, %cst_10 {dimension_numbers = #tpu.dot_dimension_numbers<[1], [1], [0], [0], [0, 0, 1, 0], [], []>} : vector<8x32xf32>, vector<3x32xf32>, vector<8x3xf32> -> vector<8x3xf32>
    %13 = arith.mulf %6#0, %6#0 : vector<3x32xf32>
    %cst_11 = arith.constant dense<0.000000e+00> : vector<1x3xf32>
    %14 = tpu.matmul %3, %13, %cst_11 {dimension_numbers = #tpu.dot_dimension_numbers<[1], [1], [0], [0], [0, 0, 1, 0], [], []>} : vector<1x32xf32>, vector<3x32xf32>, vector<1x3xf32> -> vector<1x3xf32>
    %15 = vector.broadcast %11 : vector<8x1xf32> to vector<8x3xf32>
    %16 = vector.broadcast %14 : vector<1x3xf32> to vector<8x3xf32>
    %17 = arith.addf %15, %16 : vector<8x3xf32>
    %cst_12 = arith.constant 2.000000e+00 : f32
    %18 = vector.broadcast %cst_12 : f32 to vector<8x3xf32>
    %19 = arith.mulf %18, %12 : vector<8x3xf32>
    %20 = arith.subf %17, %19 : vector<8x3xf32>
    %cst_13 = arith.constant 0.000000e+00 : f32
    %21 = vector.broadcast %cst_13 : f32 to vector<8x3xf32>
    %22 = arith.maximumf %20, %21 : vector<8x3xf32>
    %23 = vector.broadcast %6#1 : vector<8x1xi32> to vector<8x3xi32>
    %24 = arith.cmpi eq, %23, %2 : vector<8x3xi32>
    %cst_14 = arith.constant 0x7F800000 : f32
    %25 = vector.broadcast %cst_14 : f32 to vector<8x3xf32>
    %26 = arith.select %24, %22, %25 : vector<8x3xi1>, vector<8x3xf32>
    %cst_15 = arith.constant dense<0x7F800000> : vector<3xf32>
    %27 = vector.multi_reduction <minimumf>, %26, %cst_15 [0] : vector<8x3xf32> to vector<3xf32>
    %28 = vector.shape_cast %27 : vector<3xf32> to vector<1x3xf32>
    %c1_i32 = arith.constant 1 : i32
    %c0_i32_16 = arith.constant 0 : i32
    %29 = vector.broadcast %c1_i32 : i32 to vector<8x3xi32>
    %30 = vector.broadcast %c0_i32_16 : i32 to vector<8x3xi32>
    %31 = arith.select %24, %29, %30 : vector<8x3xi1>, vector<8x3xi32>
    %cst_17 = arith.constant dense<-2147483648> : vector<3xi32>
    %32 = vector.multi_reduction <maxsi>, %31, %cst_17 [0] : vector<8x3xi32> to vector<3xi32>
    %33 = vector.shape_cast %32 : vector<3xi32> to vector<1x3xi32>
    %c0_i32_18 = arith.constant 0 : i32
    %34 = vector.broadcast %c0_i32_18 : i32 to vector<1x3xi32>
    %35 = arith.cmpi sgt, %33, %34 : vector<1x3xi32>
    %36 = vector.broadcast %28 : vector<1x3xf32> to vector<8x3xf32>
    %37 = arith.cmpf oeq, %22, %36 : vector<8x3xf32>
    %38 = vector.broadcast %35 : vector<1x3xi1> to vector<8x3xi1>
    %39 = arith.andi %37, %38 : vector<8x3xi1>
    %c1_i32_19 = arith.constant 1 : i32
    %c0_i32_20 = arith.constant 0 : i32
    %40 = vector.broadcast %c1_i32_19 : i32 to vector<8x3xi32>
    %41 = vector.broadcast %c0_i32_20 : i32 to vector<8x3xi32>
    %42 = arith.select %39, %40, %41 : vector<8x3xi1>, vector<8x3xi32>
    %cst_21 = arith.constant dense<-2147483648> : vector<8xi32>
    %43 = vector.multi_reduction <maxsi>, %42, %cst_21 [1] : vector<8x3xi32> to vector<8xi32>
    %44 = vector.shape_cast %43 : vector<8xi32> to vector<8x1xi32>
    %c0_22 = arith.constant 0 : index
    %c0_23 = arith.constant 0 : index
    %45 = vector.load %arg6[%c0_22, %c0_23] : memref<8x1xi32, #tpu.memory_space<vmem>>, vector<8x1xi32>
    tpu.vector_store %arg6[%c0_22, %c0_23], %44 {strides = array<i32>} : memref<8x1xi32, #tpu.memory_space<vmem>>, vector<8x1xi32>,
    %46 = tpu.iota {dimensions = array<i32: 0>} : vector<3x128xi32>
    %47 = tpu.iota {dimensions = array<i32: 1>} : vector<3x128xi32>
    %48 = arith.cmpi eq, %46, %47 : vector<3x128xi32>
    %49 = arith.extui %48 : vector<3x128xi1> to vector<3x128xi32>
    %50 = arith.sitofp %49 : vector<3x128xi32> to vector<3x128xf32>
    %cst_24 = arith.constant dense<0.000000e+00> : vector<8x128xf32>
    %51 = tpu.matmul %22, %50, %cst_24 {dimension_numbers = #tpu.dot_dimension_numbers<[1], [0], [0], [1], [0, 0, 1, 1], [], []>} : vector<8x3xf32>, vector<3x128xf32>, vector<8x128xf32> -> vector<8x128xf32>
    %c0_25 = arith.constant 0 : index
    %c0_26 = arith.constant 0 : index
    %52 = vector.load %arg5[%c0_25, %c0_26] : memref<8x128xf32, #tpu.memory_space<vmem>>, vector<8x128xf32>
    tpu.vector_store %arg5[%c0_25, %c0_26], %51 {strides = array<i32>} : memref<8x128xf32, #tpu.memory_space<vmem>>, vector<8x128xf32>,
    return
  }
  func.func @transform_0(%arg0: i32) -> (i32, i32) {
    %c0_i32 = arith.constant 0 : i32
    %c0_i32_0 = arith.constant 0 : i32
    %c0_i32_1 = arith.constant 0 : i32
    return %c0_i32, %c0_i32_0 : i32, i32
  }
  func.func @transform_1(%arg0: i32) -> (i32, i32) {
    %c0_i32 = arith.constant 0 : i32
    %c0_i32_0 = arith.constant 0 : i32
    %c0_i32_1 = arith.constant 0 : i32
    return %c0_i32, %c0_i32_0 : i32, i32
  }
  func.func @transform_2(%arg0: i32) -> (i32, i32) {
    %c0_i32 = arith.constant 0 : i32
    %c0_i32_0 = arith.constant 0 : i32
    %c0_i32_1 = arith.constant 0 : i32
    return %c0_i32, %c0_i32_0 : i32, i32
  }
  func.func @transform_3(%arg0: i32) -> (i32, i32) {
    %c0_i32 = arith.constant 0 : i32
    %c0_i32_0 = arith.constant 0 : i32
    %c0_i32_1 = arith.constant 0 : i32
    return %c0_i32, %c0_i32_0 : i32, i32
  }
  func.func @transform_4(%arg0: i32) -> (i32, i32) {
    %c0_i32 = arith.constant 0 : i32
    %c0_i32_0 = arith.constant 0 : i32
    %c0_i32_1 = arith.constant 0 : i32
    return %c0_i32, %c0_i32_0 : i32, i32
  }
  func.func @transform_5(%arg0: i32) -> (i32, i32) {
    %c0_i32 = arith.constant 0 : i32
    %c0_i32_0 = arith.constant 0 : i32
    %c0_i32_1 = arith.constant 0 : i32
    return %c0_i32, %c0_i32_0 : i32, i32
  }
}

</mosaic_0001>

<bundles_post_ra>
// kernel: tpu_custom_call.1
= control target key start
LH: loop header
LB: loop body
LE: loop exit
PB: predicated region body
PF: predicated region fallthrough
CT: control target
= control target key end

     0   :  { %11 = vsyncpa [#allocation3], 0  ;;  %s745_s0 = inlined_call_operand.hbm [shape: f32[8,33], index: 0, kind: input, shape index: {}]   ;;  %s746_s1 = inlined_call_operand.hbm [shape: f32[3,32], index: 1, kind: input, shape index: {}]   ;;  %s747_s2 = inlined_call_operand.hbm [shape: f32[3,32], index: 2, kind: output, shape index: {0}]   ;;  %s748_s3 = inlined_call_operand.vmem [shape: s32[8,1], index: 3, kind: output, shape index: {1}]   ;;  %s749_s4 = inlined_call_operand.hbm [shape: f32[8,128], index: 4, kind: output, shape index: {2}]   ;;  %s750_s5 = inlined_call_operand.vmem [shape: s32[8,1], index: 5, kind: output, shape index: {3}]  }
   0x1   :  { %12 = vsyncpa [#allocation6], 0 }
   0x2   :  { %13 = vsyncpa [#allocation4], 0 }
   0x3   :  { %14 = vsyncpa [#allocation9], 0  ;;  %s20_s20 = sshll.u32 %s745_s0, 4  ;;  %s623_s21 = smov [#allocation2]   ;;  %s21_s20 = int_to_ptr.hbm [resolvable:$true] %s20_s20 }
   0x4   :  { %s22_s22 = sshll.u32 %s623_s21, 4  ;;  %s31_s25 = sshll.u32 %s746_s1, 4  ;;  %s23_s22 = int_to_ptr.vmem [resolvable:$true] %s22_s22  ;;  %s32_s25 = int_to_ptr.hbm [resolvable:$true] %s31_s25 }
   0x5   :  { %25 = dma.hbm_to_vmem [thread:$0]  %s21_s20, 128, %s23_s22, [#allocation3]  }
   0x6   :  { %s624_s26 = smov [#allocation5]  }
   0x7   :  { %s33_s27 = sshll.u32 %s624_s26, 4  ;;  %s34_s27 = int_to_ptr.vmem [resolvable:$true] %s33_s27 }
   0x8   :  { %36 = dma.hbm_to_vmem [thread:$0]  %s32_s25, 64, %s34_s27, [#allocation6]  }
   0x9   :  { %607 = dma.done.wait [#allocation3], 128  }
   0xa   :  { %608 = vsyncadd [#allocation3], 4294967168 }
   0xb   :  { %609 = dma.done.wait [#allocation6], 64  }
   0xc   :  { %610 = vsyncadd [#allocation6], 4294967232  ;;  %v46_v0 = vlaneseq  ;;  %v673_v2 = vld [vmem:[#allocation2] sm:$0xff]  ;;  %v48_v3 = vld [vmem:[#allocation5] sm:$0x7]   ;;  %s675_s0 = smov 0  }
   0xe   :  { %v671_v1 = vand.u32 127, %v46_v0 }
   0xf LB: > { %vm60_vm0 = vcmask 261120   ;;  %192 = vmatpush.msra.mxu2 %v673_v2  ;;  %v87_v4 = vmul.f32 %v621_v3, %v621_v3  ;;  %v625_v5 = vmov 1.0   ;;  %vm117_vm1 = vcmask 23552   ;;  %s255_s0 = sadd.s32 1, %s617_s0   ;;  %v621_v3 = vphi %v48_v3, %v751_v3   ;;  %s617_s0 = sphi %s675_s0, %s255_s0  }
  0x10   : > { %455 = vmatpush.xpose.msk.msra.mxu0 %vm60_vm0, %v621_v3  ;;  %v626_v26 = vmov 0.0   ;;  %vm173_vm5 = vcmask 64512   ;;  %v627_v29 = vmov 32   ;;  %v628_v32 = vmov 0   ;;  %p55_p1 = scmp.lt.s32.totalorder %s255_s0, 100 }
  0x11   : > { %457 = vmatpush.xpose.msk.msra.mxu1 %vm60_vm0, %v87_v4  ;;  %497 = vset.pattern.permute.xlu2 %v627_v29  ;;  %vm227_vm12 = vcmask 256000   ;;  %vm243_vm14 = vcmask 2048  }
  0x12   : > { %498 = vset.pattern.permute.xlu0 %v627_v29 }
  0x13   : > { %456 = vmatmul.msk.f32.vlgmr.msra.gmra.mxu0 %vm60_vm0, %v673_v2 }
  0x14   : > { %458 = vmatmul.msk.f32.vlgmr.msra.gmra.mxu1 %vm60_vm0, %v625_v5 }
  0x90   : > { %v84_v6 = vpop.f32.mrf.mxu0 }
  0x91   : > { %v114_v7 = vmul.f32 2.0, %v84_v6  ;;  %v111_v8 = vpop.f32.mrf.mxu1 }
  0x92   : > { %v115_v9 = vperm.slane %v111_v8, 0 }
  0x94   : > { %v116_v10 = vsub.f32 %v115_v9, %v114_v7 }
  0x96   : > { %v118_v11 = vsel %vm117_vm1, %v116_v10, inf }
  0x97   : > { %119 = vmin.xlane.f32.xlu0 %v118_v11 }
 0x10a   : > { %v120_v12 = vpop.xlane.xlu0 %119 }
 0x10b   : > { %vm121_vm2 = vcmp.eq.f32.partialorder %v116_v10, %v120_v12 }
 0x10c   : > { %v122_v13 = vsel %vm121_vm2, %v671_v1, 3 }
 0x10d   : > { %v123_v14 = vsel %vm117_vm1, %v122_v13, 2147483647 }
 0x10e   : > { %v125_v15 = vshra.s32 %v123_v14, 16  ;;  %v124_v17 = vand.u32 65535, %v123_v14 }
 0x110   : > { %v127_v16 = vcvt.s32.f32 %v125_v15  ;;  %v126_v19 = vcvt.s32.f32 %v124_v17 }
 0x112   : > { %128 = vmin.xlane.f32.xlu0 %v127_v16 }
 0x185   : > { %v129_v18 = vpop.xlane.xlu0 %128 }
 0x186   : > { %vm130_vm3 = vcmp.eq.f32.partialorder %v127_v16, %v129_v18  ;;  %v135_v21 = vcvt.f32.s32 %v129_v18 }
 0x187   : > { %v131_v20 = vsel %vm130_vm3, %v126_v19, inf }
 0x188   : > { %132 = vmin.xlane.f32.xlu1 %v131_v20  ;;  %v136_v23 = vshll.u32 %v135_v21, 16 }
 0x1fb   : > { %v133_v22 = vpop.xlane.xlu1 %132 }
 0x1fc   : > { %v134_v24 = vcvt.f32.s32 %v133_v22 }
 0x1fe   : > { %v697_v25 = vadd.s32 %v136_v23, %v134_v24 }
 0x200   : > { %vm138_vm4 = vcmp.eq.s32.totalorder %v671_v1, %v697_v25 }
 0x201   : > { %v459_v27 = vsel %vm138_vm4, 1.0, %v626_v26 }
 0x202   : > { %141 = vxpose.xlu1.b32.start.end [1/1] (short) (narrow) %v459_v27, 8 }
 0x2a6   : > { %v157_v28 = vpop.trf.xlu1 }
 0x2a7   : > { %460 = vmatmul.msk.f32.vlgmr.msra.gmra.mxu2 %vm173_vm5, %v157_v28 }
 0x32a   : > { %v194_v30 = vpop.f32.mrf.mxu2 }
 0x32b   : > { %v198_v31 = vmax.f32 %v194_v30, 1.0  ;;  %vm197_vm6 = vcmp.gt.f32.partialorder %v194_v30, 0.0 }
 0x32c   : > { %v219_v33 = vsel %vm197_vm6, 1, %v628_v32 }
 0x32d   : > { %201 = vperm.xlu2 %497, %v198_v31  }
 0x335   : > { %221 = vperm.xlu2 %497, %v219_v33  }
 0x387   : > { %v202_v34 = vpop.permute.xlu2 %201 }
 0x388   : > { %499 = vrcp.f32 %v202_v34  ;;  %v215_v38 = vand.u32 2147483648, %v202_v34  ;;  %v213_v40 = vand.u32 2147483647, %v202_v34  ;;  %vm209_vm8 = vweird.f32 %v202_v34 }
 0x38a   : > { %v216_v42 = vor.u32 1.1754944e-38, %v215_v38  ;;  %vm214_vm10 = vcmp.eq.f32.partialorder %v213_v40, 8.507059e+37 }
 0x38e   : > { %v500_v35 = vpop.eup %499 }
 0x38f   : > { %v205_v36 = vmul.f32 %v500_v35, %v202_v34  ;;  %vm210_vm7 = vweird.f32 %v500_v35  ;;  %v222_v44 = vpop.permute.xlu2 %221 }
 0x390   : > { %vm211_vm9 = vmor %vm209_vm8, %vm210_vm7  ;;  %vm223_vm11 = vcmp.eq.s32.totalorder %v222_v44, 1 }
 0x391   : > { %v206_v37 = vsub.f32 1.0, %v205_v36 }
 0x393   : > { %v207_v39 = vmul.f32 %v500_v35, %v206_v37 }
 0x395   : > { %v208_v41 = vadd.f32 %v500_v35, %v207_v39 }
 0x397   : > { %v212_v43 = vsel %vm211_vm9, %v500_v35, %v208_v41 }
 0x398   : > { %v217_v45 = vsel %vm214_vm10, %v216_v42, %v212_v43 }
 0x399   : > { %v218_v46 = vmul.f32 %v217_v45, %v194_v30 }
 0x39b   : > { %v224_v47 = vsel %vm223_vm11, %v218_v46, %v621_v3  }
 0x39c   : > { %v225_v48 = vsub.f32 %v224_v47, %v621_v3 }
 0x39e   : > { %v226_v49 = vmul.f32 %v225_v48, %v225_v48 }
 0x3a0   : > { %v228_v50 = vsel %vm227_vm12, %v226_v49, 0.0 }
 0x3a1   : > { %229 = vadd.xlane.f32.xlu0 %v228_v50 }
 0x414   : > { %v230_v51 = vpop.xlane.xlu0 %229 }
 0x415   : > { %501 = vrsqrt.f32 %v230_v51  ;;  %vm238_vm13 = vcmp.eq.f32.partialorder %v230_v51, inf  ;;  %v241_v59 = vand.u32 2147483648, %v230_v51  ;;  %vm240_vm15 = vcmp.eq.f32.partialorder %v230_v51, 0.0 }
 0x41b   : > { %v502_v52 = vpop.eup %501 }
 0x41c   : > { %v232_v53 = vmul.f32 %v502_v52, %v230_v51 }
 0x41e   : > { %v233_v54 = vmul.f32 %v502_v52, %v232_v53 }
 0x420   : > { %v234_v55 = vmul.f32 0.5, %v233_v54 }
 0x422   : > { %v235_v56 = vsub.f32 1.5, %v234_v55 }
 0x424   : > { %v236_v57 = vmul.f32 %v502_v52, %v235_v56 }
 0x426   : > { %v237_v58 = vmul.f32 %v236_v57, %v230_v51 }
 0x428   : > { %v239_v60 = vsel %vm238_vm13, %v230_v51, %v237_v58 }
 0x429   : > { %v242_v61 = vsel %vm240_vm15, %v241_v59, %v239_v60 }
 0x42a   : > { %v244_v62 = vsel %vm243_vm14, %v242_v61, 0.0 }
 0x42b   : > { %245 = vadd.xlane.f32.xlu2 %v244_v62 }
 0x49e   : > { %v246_v63 = vpop.xlane.xlu2 %245 }
 0x49f   : > { %v247_v3 = vrot.slane %v246_v63, 4 }
 0x4a1   : > { %v248_v4 = vadd.f32 %v247_v3, %v246_v63  ;;  %v751_v3 = vmov %v224_v47 }
 0x4a3   : > { %v249_v5 = vrot.slane %v248_v4, 2 }
 0x4a5   : > { %v250_v6 = vadd.f32 %v249_v5, %v248_v4 }
 0x4a7   : > { %v251_v7 = vrot.slane %v250_v6, 1 }
 0x4a9   : > { %v252_v8 = vadd.f32 %v251_v7, %v250_v6 }
 0x4ab   : > { %468 = vpush %v252_v8 }
 0x4dc   : > { %s469_s1 = spop %468 }
 0x4dd   : > { %s254_s28 = smul.f32 %s469_s1, %s469_s1 }
 0x4df   : > { %p54_p0 = scmp.ge.f32.partialorder %s254_s28, 1e-06 }
 0x4e1   : > { %p56_p2 = pnand %p55_p1, %p54_p0 }
 0x4e2   :  { %v291_v9 = vmul.f32 (%p56_p2), %v224_v47, %v224_v47  ;;  %461 = vmatpush.xpose.msk.msra.mxu0 (%p56_p2), %vm60_vm0, %v224_v47  ;;  %v260_v10 = vmul.f32 (%p56_p2), %v673_v2, %v673_v2  ;;  %257 = vst.msk [vmem:[#allocation7] sm:$0x7] (%p56_p2), %vm227_vm12, %v224_v47  ;;  %v629_v12 = vmov (%p56_p2), 1.0   ;;  %v367_v13 = vshrl.u32 (%p56_p2), %v46_v0, 7  ;;  %s632_s29 = smov (%p56_p2), [#allocation7]   ;;  %s406_s8 = sshll.u32 (%p56_p2), %s747_s2, 4  ;;  %s407_s8 = int_to_ptr.hbm [resolvable:$true] %s406_s8 }
 0x4e3   :  { %59 = sbr.rel (!%p56_p2) target bundleno = 15 (0xf), region = 67  ;;  %v630_v14 = vmov (%p56_p2), 0.0   ;;  %vm374_vm3 = vcmask (%p56_p2), 1042432   ;;  %vm323_vm4 = vcmp.eq.s32.totalorder (%p56_p2), %v697_v25, %v671_v1  ;;  %v631_v16 = vmov (%p56_p2), 0   ;;  %s404_s30 = sshll.u32 (%p56_p2), %s632_s29, 4  ;;  %s405_s30 = int_to_ptr.vmem [resolvable:$true] %s404_s30 }
 0x4e4   :  { %463 = vmatpush.xpose.msk.msra.mxu1 (%p56_p2), %vm60_vm0, %v291_v9  ;;  %v262_v11 = vsel (%p56_p2), %vm60_vm0, %v260_v10, 0.0  ;;  %vm368_vm2 = vcmp.eq.s32.totalorder (%p56_p2), %v367_v13, %v671_v1  ;;  %409 = dma.vmem_to_hbm [thread:$0]  (%p56_p2), %s405_s30, 64, %s407_s8, [#allocation4]   ;;  %vm258_vm10 = vcmask (%p56_p2), 7168  }
 0x4e5   :  { %462 = vmatmul.msk.f32.vlgmr.msra.gmra.mxu0 (%p56_p2), %vm60_vm0, %v673_v2  ;;  %263 = vadd.xlane.f32.xlu0 (%p56_p2), %v262_v11  ;;  %v465_v15 = vsel (%p56_p2), %vm368_vm2, 1.0, %v630_v14  ;;  %v333_v2 = vsel (%p56_p2), %vm323_vm4, 1, %v631_v16  ;;  %s633_s9 = smov (%p56_p2), [#allocation8]   ;;  %s419_s13 = sshll.u32 (%p56_p2), %s749_s4, 4  ;;  %259 = vst.msk [vmem:[%s748_s3] sm:$0xff] (%p56_p2), %vm258_vm10, %v697_v25  ;;  %s420_s13 = int_to_ptr.hbm [resolvable:$true] %s419_s13 }
 0x4e6   :  { %466 = vmatpush.msk.msra.mxu2 (%p56_p2), %vm374_vm3, %v465_v15  ;;  %v334_v17 = vsel (%p56_p2), %vm117_vm1, %v333_v2, 2147483648  ;;  %s417_s10 = sshll.u32 (%p56_p2), %s633_s9, 4  ;;  %s418_s10 = int_to_ptr.vmem [resolvable:$true] %s417_s10 }
 0x4e7   :  { %464 = vmatmul.msk.f32.vlgmr.msra.gmra.mxu1 (%p56_p2), %vm60_vm0, %v629_v12  ;;  %v335_v18 = vrot.slane (%p56_p2), %v334_v17, 4 }
 0x4e9   :  { %vm336_vm0 = vcmp.gt.s32.totalorder %v334_v17, %v335_v18 }
 0x4ea   :  { %v337_v0 = vsel %vm336_vm0, %v334_v17, %v335_v18 }
 0x4eb   :  { %v338_v24 = vrot.slane %v337_v0, 2 }
 0x4ed   :  { %vm339_vm5 = vcmp.gt.s32.totalorder %v337_v0, %v338_v24 }
 0x4ee   :  { %v340_v29 = vsel %vm339_vm5, %v337_v0, %v338_v24 }
 0x4ef   :  { %v341_v33 = vrot.slane %v340_v29, 1 }
 0x4f1   :  { %vm342_vm6 = vcmp.gt.s32.totalorder %v340_v29, %v341_v33 }
 0x4f2   :  { %v343_v37 = vsel %vm342_vm6, %v340_v29, %v341_v33 }
 0x4f3   :  { %vm344_vm7 = vcmp.gt.s32.totalorder %v343_v37, 0 }
 0x558   :  { %v264_v21 = vpop.xlane.xlu0 %263 }
 0x562   :  { %v288_v19 = vpop.f32.mrf.mxu0 }
 0x563   :  { %v320_v23 = vmul.f32 2.0, %v288_v19 }
 0x564   :  { %v315_v20 = vpop.f32.mrf.mxu1 }
 0x565   :  { %v318_v22 = vperm.slane %v315_v20, 0 }
 0x567   :  { %v319_v26 = vadd.f32 %v318_v22, %v264_v21 }
 0x569   :  { %v321_v27 = vsub.f32 %v319_v26, %v320_v23 }
 0x56b   :  { %v322_v28 = vmax.f32 %v321_v27, 0.0 }
 0x56d   :  { %467 = vmatmul.msk.f32.vlgmr.msra.gmra.mxu2 %vm117_vm1, %v322_v28  ;;  %v324_v30 = vsel %vm323_vm4, %v322_v28, inf }
 0x56e   :  { %v326_v31 = vsel %vm117_vm1, %v324_v30, inf }
 0x56f   :  { %v327_v32 = vrot.slane %v326_v31, 4 }
 0x571   :  { %v328_v34 = vmin.f32 %v326_v31, %v327_v32 }
 0x573   :  { %v329_v35 = vrot.slane %v328_v34, 2 }
 0x575   :  { %v330_v36 = vmin.f32 %v328_v34, %v329_v35 }
 0x577   :  { %v331_v38 = vrot.slane %v330_v36, 1 }
 0x579   :  { %v332_v39 = vmin.f32 %v330_v36, %v331_v38 }
 0x57b   :  { %vm345_vm8 = vcmp.eq.f32.partialorder %v322_v28, %v332_v39 }
 0x57c   :  { %vm348_vm9 = vmand %vm345_vm8, %vm344_vm7 }
 0x57d   :  { %v349_v40 = vsel %vm348_vm9, 1, %v631_v16 }
 0x57e   :  { %v350_v41 = vsel %vm117_vm1, %v349_v40, 2147483648 }
 0x57f   :  { %v352_v42 = vshra.s32 %v350_v41, 16  ;;  %v351_v44 = vand.u32 65535, %v350_v41 }
 0x581   :  { %v354_v1 = vcvt.s32.f32 %v352_v42  ;;  %v353_v46 = vcvt.s32.f32 %v351_v44 }
 0x583   :  { %355 = vmax.xlane.f32.xlu0 %v354_v1 }
 0x5f0   :  { %v395_v43 = vpop.f32.mrf.mxu2 }
 0x5f1   :  { %398 = vst [vmem:[#allocation8] sm:$0xff] %v395_v43 }
 0x5f2   :  { %422 = dma.vmem_to_hbm [thread:$0]  %s418_s10, 128, %s420_s13, [#allocation9]  }
 0x5f6   :  { %v356_v45 = vpop.xlane.xlu0 %355 }
 0x5f7   :  { %vm357_vm1 = vcmp.eq.f32.partialorder %v354_v1, %v356_v45  ;;  %v362_v48 = vcvt.f32.s32 %v356_v45 }
 0x5f8   :  { %v358_v47 = vsel %vm357_vm1, %v353_v46, -inf }
 0x5f9   :  { %359 = vmax.xlane.f32.xlu1 %v358_v47  ;;  %v363_v50 = vshll.u32 %v362_v48, 16 }
 0x66c   :  { %v360_v49 = vpop.xlane.xlu1 %359 }
 0x66d   :  { %v361_v51 = vcvt.f32.s32 %v360_v49 }
 0x66f   :  { %v364_v52 = vadd.s32 %v363_v50, %v361_v51 }
 0x671   :  { %365 = vst.msk [vmem:[%s750_s5] sm:$0xff] %vm258_vm10, %v364_v52 }
 0x672   :  { %611 = dma.done.wait [#allocation4], 64  }
 0x673   :  { %612 = vsyncadd [#allocation4], 4294967232 }
 0x674   :  { %613 = dma.done.wait [#allocation9], 128  }
 0x675   :  { %614 = vsyncadd [#allocation9], 4294967168 }
 0x676   :  { %437 = vsyncpa [#allocation3], 1 }
 0x677   :  { %438 = vsyncpa [#allocation6], 1 }
 0x678   :  { %439 = vsyncpa [#allocation4], 1 }
 0x679   :  { %440 = vsyncpa [#allocation9], 1 }

</bundles_post_ra>
